<compile_context>
chip_gen: v6e
topology: v6e:2x2x1
jax: 0.10.0
libtpu: 0.0.40
codegen_flags: <defaults>
</compile_context>

<pallas_src>
import functools

import jax
import jax.numpy as jnp
import numpy as np
from jax.experimental import pallas as pl
from jax.experimental.pallas import tpu as pltpu


# --------------------------------- kernel ---------------------------------
def _lpc_kernel(frames_ref, out_ref, *, num_code: int, windows: int):
    """Circular autocorrelation (lags 0..num_code) + Levinson-Durbin.

    frames_ref: [windows, TR] float32 — TR frame rows on the lane axis.
    out_ref   : [num_code, TR] float32 — lane-dense coefficients (row stores).
    """
    w = windows
    eps = jnp.float32(1e-7)

    x = frames_ref[...]                                      # [w, TR]

    # ---- circular autocorrelation r[k] = sum_t x[t] * x[(t + k) % w] ----
    # (identical to irfft(|rfft(x)|^2)[k] used by the PyTorch reference)
    # One circular extension (num_code extra sublane rows) makes every lag a
    # single contiguous slice + one fused multiply-reduce; reductions run over
    # the sublane (window) axis so every per-frame result is lane-dense [1, TR].
    xe = jnp.concatenate([x, x[:num_code, :]], axis=0)       # [w + num_code, TR]
    r = [jnp.sum(x * x, axis=0, keepdims=True)]              # lag 0, [1, TR]
    for k in range(1, num_code + 1):
        r.append(jnp.sum(x * xe[k:k + w, :], axis=0, keepdims=True))

    # clamped reciprocal: EUP approximate recip + two Newton-Raphson refinements
    # (the error otherwise feeds through all Levinson iterations via `extra`).
    def recip(d):
        d = jnp.maximum(d, eps)
        inv = pl.reciprocal(d, approx=True)
        inv = inv * (2.0 - d * inv)
        inv = inv * (2.0 - d * inv)
        return inv

    # ---- Levinson-Durbin (solve_toeplitz), fully unrolled (num_code static) ----
    ones = jnp.ones_like(r[0])
    sol = [ones, -r[1] * recip(r[0])]                        # [1, -r1/max(r0,eps)]
    extra = r[0] + r[1] * sol[1]
    for k in range(1, num_code):
        # lambda = -(sol[:k+1] . flip(r[1:k+2])) / max(extra, eps)
        acc = sol[0] * r[k + 1]
        for i in range(1, k + 1):
            acc = acc + sol[i] * r[k + 1 - i]
        lam = -acc * recip(extra)
        aug = sol + [jnp.zeros_like(r[0])]                   # pad one zero
        sol = [aug[i] + lam * aug[k + 1 - i] for i in range(k + 2)]
        extra = (1.0 - lam * lam) * extra

    # lane-dense output, written row-by-row (no sublane concat/merge pass).
    for i in range(num_code):
        out_ref[pl.ds(i, 1), :] = sol[i + 1]


# ----------------------------- chip introspection -----------------------------
def _tpu_hw():
    """Best-effort (VMEM capacity bytes or None, TensorCores per chip)."""
    vmem = None
    cores = 1
    try:
        info = pltpu.get_tpu_info()
        v = getattr(info, "vmem_capacity_bytes", None)
        if v:
            vmem = int(v)
        for name in ("num_tensorcores", "tensorcores_per_chip", "num_cores", "core_count"):
            c = getattr(info, name, None)
            if c:
                cores = max(1, int(c))
                break
    except Exception:
        pass
    return vmem, cores


def _pick_row_tile(rows: int, windows: int, num_code: int, requested: int):
    """Pick the lane tile (multiple of 128) and the scoped VMEM limit.

    Sized so double-buffered input/output blocks plus in-kernel temporaries fit
    comfortably; >=2 grid steps per TensorCore only on multi-core (v7x) chips.
    """
    lane = 128
    rows_p = -(-rows // lane) * lane
    vmem_bytes, cores = _tpu_hw()
    if vmem_bytes:
        # 5/8 of physical: 40 MiB on v7x (64 MiB), 80 MiB on v5e/v6e (128 MiB).
        vmem_limit = int(min(max(vmem_bytes * 5 // 8, 32 * 1024 * 1024), 80 * 1024 * 1024))
    else:
        vmem_limit = 40 * 1024 * 1024   # conservative: leaves headroom even on v7x

    # Resident f32 bytes per lane column: 2x double-buffered input block (w rows)
    # + 2x output block (num_code rows) + ~3 w-row in-kernel temporaries
    # (x, circular extension, fused product/partials).
    per_lane = 4 * (2 * windows + 2 * num_code + 3 * (windows + num_code))
    by_vmem = max(lane, ((vmem_limit * 3 // 4) // per_lane) // lane * lane)
    tile = max(lane, min(requested, by_vmem, rows_p))

    # >=2 grid steps per TensorCore (v7x has 2) so each core still double-buffers,
    # but never shrink below 512 lanes (keeps stores lane-dense and the ~0.35 us
    # per-step overhead negligible).  Single-TC chips keep one big tile.
    if cores > 1:
        want = 2 * cores
        if rows_p >= want * 512:
            tile = min(tile, max(512, (rows_p // want) // lane * lane))
    return tile, vmem_limit


# --------------------------------- wrapper ---------------------------------
def lpc_forward(inputs: jax.Array, *, num_code: int, windows: int, strides: int,
                row_tile: int = 2048) -> jax.Array:
    """LPC forward pass.  inputs: [B, T] float32 -> [B, T//strides + 1, num_code]."""
    if num_code < 1 or num_code >= windows:
        raise ValueError("need 1 <= num_code < windows for circular autocorrelation lags")
    if strides < 1:
        raise ValueError("strides must be >= 1")
    inputs = inputs.astype(jnp.float32)
    B, T = inputs.shape
    w = windows

    n_frames = T // strides + 1
    rows = B * n_frames
    tile, vmem_limit = _pick_row_tile(rows, w, num_code, row_tile)
    rows_p = -(-rows // tile) * tile

    # --- framing: single gather straight into the lane-dense [w, rows_p] layout ---
    # frame r = b*n_frames + f  starts at flat index b*(T+w) + f*strides.
    padded = jnp.pad(inputs, ((0, 0), (0, w)))                                   # [B, T+w]
    flat = padded.reshape(-1)                                                    # [B*(T+w)]
    starts = (jnp.arange(B, dtype=jnp.int32)[:, None] * (T + w)
              + jnp.arange(n_frames, dtype=jnp.int32)[None, :] * strides).reshape(-1)
    if rows_p != rows:
        # padded lane columns re-read frame 0 (valid data, results sliced off below;
        # all divisions in the recursion are additionally clamped by 1e-7).
        starts = jnp.pad(starts, (0, rows_p - rows))
    idx = jnp.arange(w, dtype=jnp.int32)[:, None] + starts[None, :]              # [w, rows_p]
    frames_t = jnp.take(flat, idx, axis=0)                                       # [w, rows_p]

    kernel = functools.partial(_lpc_kernel, num_code=num_code, windows=w)
    cost = pl.CostEstimate(
        flops=rows_p * (2 * w * (num_code + 1) + 4 * num_code * num_code),
        transcendentals=rows_p * (num_code + 1),
        bytes_accessed=4 * (w * rows_p + num_code * rows_p),
    )
    out = pl.pallas_call(
        kernel,
        out_shape=jax.ShapeDtypeStruct((num_code, rows_p), jnp.float32),
        grid_spec=pltpu.PrefetchScalarGridSpec(
            num_scalar_prefetch=0,
            grid=(rows_p // tile,),
            in_specs=[pl.BlockSpec((w, tile), lambda i: (0, i))],
            out_specs=pl.BlockSpec((num_code, tile), lambda i: (0, i)),
        ),
        compiler_params=pltpu.CompilerParams(
            dimension_semantics=("parallel",),
            vmem_limit_bytes=vmem_limit,
        ),
        cost_estimate=cost,
    )(frames_t)                                                                  # [num_code, rows_p]

    return out[:, :rows].T.reshape(B, n_frames, num_code)


# ----------------------------- pure-JAX reference -----------------------------
def _lpc_reference(inputs, num_code, windows, strides):
    B, T = inputs.shape
    w = windows
    padded = jnp.pad(inputs, ((0, 0), (0, w)))
    n_frames = T // strides + 1
    idx = jnp.arange(n_frames)[:, None] * strides + jnp.arange(w)[None, :]
    frames = padded[:, idx]                                       # [B, F, w]
    fft = jnp.fft.rfft(frames, axis=-1)
    corr = jnp.fft.irfft(jnp.abs(fft) ** 2, axis=-1)[..., : num_code + 1]

    sol = jnp.concatenate(
        [jnp.ones_like(corr[..., :1]),
         -corr[..., 1:2] / jnp.maximum(corr[..., 0:1], 1e-7)], axis=-1)
    extra = corr[..., 0] + corr[..., 1] * sol[..., 1]
    for k in range(1, num_code):
        lam = jnp.sum(-sol[..., :k + 1] * jnp.flip(corr[..., 1:k + 2], axis=-1),
                      axis=-1) / jnp.maximum(extra, 1e-7)
        aug = jnp.pad(sol, [(0, 0)] * (sol.ndim - 1) + [(0, 1)])
        sol = aug + lam[..., None] * jnp.flip(aug, axis=-1)
        extra = (1.0 - lam ** 2) * extra
    return sol[..., 1:]


if __name__ == "__main__":
    key = jax.random.PRNGKey(0)
    B, T = 2, 64
    num_code, windows, strides = 4, 16, 8

    x = jax.random.normal(key, (B, T), dtype=jnp.float32)

    out = lpc_forward(x, num_code=num_code, windows=windows, strides=strides)
    out = jax.block_until_ready(out)
    assert out.shape == (B, T // strides + 1, num_code)
    assert out.dtype == jnp.float32

    ref = _lpc_reference(x, num_code, windows, strides)
    np.testing.assert_allclose(np.asarray(out), np.asarray(ref), rtol=1e-3, atol=1e-3)

    print("KERNEL_OK")
</pallas_src>

<mosaic_0001>
module attributes {stable_mosaic.version = 11 : i64} {
  func.func @_lpc_kernel(%arg0: i32, %arg1: memref<16x128xf32, #tpu.memory_space<vmem>>, %arg2: memref<4x128xf32, #tpu.memory_space<vmem>>) attributes {dimension_semantics = [#tpu.dimension_semantics<parallel>], iteration_bounds = array<i64: 1>, scalar_prefetch = 0 : i64, scratch_operands = 0 : i64, tpu.core_type = #tpu.core_type<tc>, window_params = [{transform_indices = @transform_0, window_bounds = array<i64: 16, 128>}, {transform_indices = @transform_1, window_bounds = array<i64: 4, 128>}]} {
    %c0 = arith.constant 0 : index
    %c0_0 = arith.constant 0 : index
    %0 = vector.load %arg1[%c0, %c0_0] : memref<16x128xf32, #tpu.memory_space<vmem>>, vector<16x128xf32>
    %1 = vector.extract_strided_slice %0 {offsets = [0, 0], sizes = [4, 128], strides = [1, 1]} : vector<16x128xf32> to vector<4x128xf32>
    %2 = tpu.concatenate %0, %1 in 0 : vector<16x128xf32>, vector<4x128xf32> -> vector<20x128xf32>
    %3 = arith.mulf %0, %0 : vector<16x128xf32>
    %cst = arith.constant dense<0.000000e+00> : vector<128xf32>
    %4 = vector.multi_reduction <add>, %3, %cst [0] : vector<16x128xf32> to vector<128xf32>
    %5 = vector.shape_cast %4 : vector<128xf32> to vector<1x128xf32>
    %6 = vector.extract_strided_slice %2 {offsets = [1, 0], sizes = [16, 128], strides = [1, 1]} : vector<20x128xf32> to vector<16x128xf32>
    %7 = arith.mulf %0, %6 : vector<16x128xf32>
    %cst_1 = arith.constant dense<0.000000e+00> : vector<128xf32>
    %8 = vector.multi_reduction <add>, %7, %cst_1 [0] : vector<16x128xf32> to vector<128xf32>
    %9 = vector.shape_cast %8 : vector<128xf32> to vector<1x128xf32>
    %10 = vector.extract_strided_slice %2 {offsets = [2, 0], sizes = [16, 128], strides = [1, 1]} : vector<20x128xf32> to vector<16x128xf32>
    %11 = arith.mulf %0, %10 : vector<16x128xf32>
    %cst_2 = arith.constant dense<0.000000e+00> : vector<128xf32>
    %12 = vector.multi_reduction <add>, %11, %cst_2 [0] : vector<16x128xf32> to vector<128xf32>
    %13 = vector.shape_cast %12 : vector<128xf32> to vector<1x128xf32>
    %14 = vector.extract_strided_slice %2 {offsets = [3, 0], sizes = [16, 128], strides = [1, 1]} : vector<20x128xf32> to vector<16x128xf32>
    %15 = arith.mulf %0, %14 : vector<16x128xf32>
    %cst_3 = arith.constant dense<0.000000e+00> : vector<128xf32>
    %16 = vector.multi_reduction <add>, %15, %cst_3 [0] : vector<16x128xf32> to vector<128xf32>
    %17 = vector.shape_cast %16 : vector<128xf32> to vector<1x128xf32>
    %18 = vector.extract_strided_slice %2 {offsets = [4, 0], sizes = [16, 128], strides = [1, 1]} : vector<20x128xf32> to vector<16x128xf32>
    %19 = arith.mulf %0, %18 : vector<16x128xf32>
    %cst_4 = arith.constant dense<0.000000e+00> : vector<128xf32>
    %20 = vector.multi_reduction <add>, %19, %cst_4 [0] : vector<16x128xf32> to vector<128xf32>
    %21 = vector.shape_cast %20 : vector<128xf32> to vector<1x128xf32>
    %cst_5 = arith.constant 1.000000e+00 : f32
    %22 = vector.broadcast %cst_5 : f32 to vector<1x128xf32>
    %cst_6 = arith.constant 0.000000e+00 : f32
    %23 = vector.broadcast %cst_6 : f32 to vector<1x128xf32>
    %24 = arith.subf %23, %9 : vector<1x128xf32>
    %cst_7 = arith.constant 1.000000e-07 : f32
    %25 = vector.broadcast %cst_7 : f32 to vector<1x128xf32>
    %26 = arith.maximumf %5, %25 : vector<1x128xf32>
    %27 = tpu.reciprocal %26 {approx = true} : vector<1x128xf32> -> vector<1x128xf32>
    %28 = arith.mulf %26, %27 : vector<1x128xf32>
    %cst_8 = arith.constant 2.000000e+00 : f32
    %29 = vector.broadcast %cst_8 : f32 to vector<1x128xf32>
    %30 = arith.subf %29, %28 : vector<1x128xf32>
    %31 = arith.mulf %27, %30 : vector<1x128xf32>
    %32 = arith.mulf %26, %31 : vector<1x128xf32>
    %cst_9 = arith.constant 2.000000e+00 : f32
    %33 = vector.broadcast %cst_9 : f32 to vector<1x128xf32>
    %34 = arith.subf %33, %32 : vector<1x128xf32>
    %35 = arith.mulf %31, %34 : vector<1x128xf32>
    %36 = arith.mulf %24, %35 : vector<1x128xf32>
    %37 = arith.mulf %9, %36 : vector<1x128xf32>
    %38 = arith.addf %5, %37 : vector<1x128xf32>
    %39 = arith.mulf %22, %13 : vector<1x128xf32>
    %40 = arith.mulf %36, %9 : vector<1x128xf32>
    %41 = arith.addf %39, %40 : vector<1x128xf32>
    %cst_10 = arith.constant 0.000000e+00 : f32
    %42 = vector.broadcast %cst_10 : f32 to vector<1x128xf32>
    %43 = arith.subf %42, %41 : vector<1x128xf32>
    %cst_11 = arith.constant 1.000000e-07 : f32
    %44 = vector.broadcast %cst_11 : f32 to vector<1x128xf32>
    %45 = arith.maximumf %38, %44 : vector<1x128xf32>
    %46 = tpu.reciprocal %45 {approx = true} : vector<1x128xf32> -> vector<1x128xf32>
    %47 = arith.mulf %45, %46 : vector<1x128xf32>
    %cst_12 = arith.constant 2.000000e+00 : f32
    %48 = vector.broadcast %cst_12 : f32 to vector<1x128xf32>
    %49 = arith.subf %48, %47 : vector<1x128xf32>
    %50 = arith.mulf %46, %49 : vector<1x128xf32>
    %51 = arith.mulf %45, %50 : vector<1x128xf32>
    %cst_13 = arith.constant 2.000000e+00 : f32
    %52 = vector.broadcast %cst_13 : f32 to vector<1x128xf32>
    %53 = arith.subf %52, %51 : vector<1x128xf32>
    %54 = arith.mulf %50, %53 : vector<1x128xf32>
    %55 = arith.mulf %43, %54 : vector<1x128xf32>
    %cst_14 = arith.constant 0.000000e+00 : f32
    %56 = vector.broadcast %cst_14 : f32 to vector<1x128xf32>
    %57 = arith.mulf %55, %56 : vector<1x128xf32>
    %58 = arith.addf %22, %57 : vector<1x128xf32>
    %59 = arith.mulf %55, %36 : vector<1x128xf32>
    %60 = arith.addf %36, %59 : vector<1x128xf32>
    %61 = arith.mulf %55, %22 : vector<1x128xf32>
    %62 = arith.addf %56, %61 : vector<1x128xf32>
    %63 = arith.mulf %55, %55 : vector<1x128xf32>
    %cst_15 = arith.constant 1.000000e+00 : f32
    %64 = vector.broadcast %cst_15 : f32 to vector<1x128xf32>
    %65 = arith.subf %64, %63 : vector<1x128xf32>
    %66 = arith.mulf %65, %38 : vector<1x128xf32>
    %67 = arith.mulf %58, %17 : vector<1x128xf32>
    %68 = arith.mulf %60, %13 : vector<1x128xf32>
    %69 = arith.addf %67, %68 : vector<1x128xf32>
    %70 = arith.mulf %62, %9 : vector<1x128xf32>
    %71 = arith.addf %69, %70 : vector<1x128xf32>
    %cst_16 = arith.constant 0.000000e+00 : f32
    %72 = vector.broadcast %cst_16 : f32 to vector<1x128xf32>
    %73 = arith.subf %72, %71 : vector<1x128xf32>
    %cst_17 = arith.constant 1.000000e-07 : f32
    %74 = vector.broadcast %cst_17 : f32 to vector<1x128xf32>
    %75 = arith.maximumf %66, %74 : vector<1x128xf32>
    %76 = tpu.reciprocal %75 {approx = true} : vector<1x128xf32> -> vector<1x128xf32>
    %77 = arith.mulf %75, %76 : vector<1x128xf32>
    %cst_18 = arith.constant 2.000000e+00 : f32
    %78 = vector.broadcast %cst_18 : f32 to vector<1x128xf32>
    %79 = arith.subf %78, %77 : vector<1x128xf32>
    %80 = arith.mulf %76, %79 : vector<1x128xf32>
    %81 = arith.mulf %75, %80 : vector<1x128xf32>
    %cst_19 = arith.constant 2.000000e+00 : f32
    %82 = vector.broadcast %cst_19 : f32 to vector<1x128xf32>
    %83 = arith.subf %82, %81 : vector<1x128xf32>
    %84 = arith.mulf %80, %83 : vector<1x128xf32>
    %85 = arith.mulf %73, %84 : vector<1x128xf32>
    %cst_20 = arith.constant 0.000000e+00 : f32
    %86 = vector.broadcast %cst_20 : f32 to vector<1x128xf32>
    %87 = arith.mulf %85, %86 : vector<1x128xf32>
    %88 = arith.addf %58, %87 : vector<1x128xf32>
    %89 = arith.mulf %85, %62 : vector<1x128xf32>
    %90 = arith.addf %60, %89 : vector<1x128xf32>
    %91 = arith.mulf %85, %60 : vector<1x128xf32>
    %92 = arith.addf %62, %91 : vector<1x128xf32>
    %93 = arith.mulf %85, %58 : vector<1x128xf32>
    %94 = arith.addf %86, %93 : vector<1x128xf32>
    %95 = arith.mulf %85, %85 : vector<1x128xf32>
    %cst_21 = arith.constant 1.000000e+00 : f32
    %96 = vector.broadcast %cst_21 : f32 to vector<1x128xf32>
    %97 = arith.subf %96, %95 : vector<1x128xf32>
    %98 = arith.mulf %97, %66 : vector<1x128xf32>
    %99 = arith.mulf %88, %21 : vector<1x128xf32>
    %100 = arith.mulf %90, %17 : vector<1x128xf32>
    %101 = arith.addf %99, %100 : vector<1x128xf32>
    %102 = arith.mulf %92, %13 : vector<1x128xf32>
    %103 = arith.addf %101, %102 : vector<1x128xf32>
    %104 = arith.mulf %94, %9 : vector<1x128xf32>
    %105 = arith.addf %103, %104 : vector<1x128xf32>
    %cst_22 = arith.constant 0.000000e+00 : f32
    %106 = vector.broadcast %cst_22 : f32 to vector<1x128xf32>
    %107 = arith.subf %106, %105 : vector<1x128xf32>
    %cst_23 = arith.constant 1.000000e-07 : f32
    %108 = vector.broadcast %cst_23 : f32 to vector<1x128xf32>
    %109 = arith.maximumf %98, %108 : vector<1x128xf32>
    %110 = tpu.reciprocal %109 {approx = true} : vector<1x128xf32> -> vector<1x128xf32>
    %111 = arith.mulf %109, %110 : vector<1x128xf32>
    %cst_24 = arith.constant 2.000000e+00 : f32
    %112 = vector.broadcast %cst_24 : f32 to vector<1x128xf32>
    %113 = arith.subf %112, %111 : vector<1x128xf32>
    %114 = arith.mulf %110, %113 : vector<1x128xf32>
    %115 = arith.mulf %109, %114 : vector<1x128xf32>
    %cst_25 = arith.constant 2.000000e+00 : f32
    %116 = vector.broadcast %cst_25 : f32 to vector<1x128xf32>
    %117 = arith.subf %116, %115 : vector<1x128xf32>
    %118 = arith.mulf %114, %117 : vector<1x128xf32>
    %119 = arith.mulf %107, %118 : vector<1x128xf32>
    %cst_26 = arith.constant 0.000000e+00 : f32
    %120 = vector.broadcast %cst_26 : f32 to vector<1x128xf32>
    %121 = arith.mulf %119, %94 : vector<1x128xf32>
    %122 = arith.addf %90, %121 : vector<1x128xf32>
    %123 = arith.mulf %119, %92 : vector<1x128xf32>
    %124 = arith.addf %92, %123 : vector<1x128xf32>
    %125 = arith.mulf %119, %90 : vector<1x128xf32>
    %126 = arith.addf %94, %125 : vector<1x128xf32>
    %127 = arith.mulf %119, %88 : vector<1x128xf32>
    %128 = arith.addf %120, %127 : vector<1x128xf32>
    %c0_27 = arith.constant 0 : index
    %c0_28 = arith.constant 0 : index
    %129 = vector.load %arg2[%c0_27, %c0_28] : memref<4x128xf32, #tpu.memory_space<vmem>>, vector<1x128xf32>
    tpu.vector_store %arg2[%c0_27, %c0_28], %122 {strides = array<i32>} : memref<4x128xf32, #tpu.memory_space<vmem>>, vector<1x128xf32>,
    %c1 = arith.constant 1 : index
    %c0_29 = arith.constant 0 : index
    %130 = vector.load %arg2[%c1, %c0_29] : memref<4x128xf32, #tpu.memory_space<vmem>>, vector<1x128xf32>
    tpu.vector_store %arg2[%c1, %c0_29], %124 {strides = array<i32>} : memref<4x128xf32, #tpu.memory_space<vmem>>, vector<1x128xf32>,
    %c2 = arith.constant 2 : index
    %c0_30 = arith.constant 0 : index
    %131 = vector.load %arg2[%c2, %c0_30] : memref<4x128xf32, #tpu.memory_space<vmem>>, vector<1x128xf32>
    tpu.vector_store %arg2[%c2, %c0_30], %126 {strides = array<i32>} : memref<4x128xf32, #tpu.memory_space<vmem>>, vector<1x128xf32>,
    %c3 = arith.constant 3 : index
    %c0_31 = arith.constant 0 : index
    %132 = vector.load %arg2[%c3, %c0_31] : memref<4x128xf32, #tpu.memory_space<vmem>>, vector<1x128xf32>
    tpu.vector_store %arg2[%c3, %c0_31], %128 {strides = array<i32>} : memref<4x128xf32, #tpu.memory_space<vmem>>, vector<1x128xf32>,
    return
  }
  func.func @transform_0(%arg0: i32) -> (i32, i32) {
    %c0_i32 = arith.constant 0 : i32
    %c0_i32_0 = arith.constant 0 : i32
    return %c0_i32, %arg0 : i32, i32
  }
  func.func @transform_1(%arg0: i32) -> (i32, i32) {
    %c0_i32 = arith.constant 0 : i32
    %c0_i32_0 = arith.constant 0 : i32
    return %c0_i32, %arg0 : i32, i32
  }
}

</mosaic_0001>

<bundles_post_ra>
// kernel: tpu_custom_call.1
= control target key start
LH: loop header
LB: loop body
LE: loop exit
PB: predicated region body
PF: predicated region fallthrough
CT: control target
= control target key end

     0   :  { %6 = vsyncpa [#allocation3], 0  ;;  %s287_s0 = inlined_call_operand.hbm [shape: f32[16,128], index: 0, kind: input, shape index: {}]   ;;  %s288_s1 = inlined_call_operand.hbm [shape: f32[4,128], index: 1, kind: output, shape index: {}]  }
   0x1   :  { %7 = vsyncpa [#allocation4], 0  ;;  %s257_s6 = smov [#allocation2]  }
   0x2   :  { %s13_s7 = sshll.u32 %s257_s6, 4  ;;  %s14_s7 = int_to_ptr.vmem [resolvable:$true] %s13_s7 }
   0x3   :  { %s221_s8 = scalar_lea.vmem %s14_s7, 256  ;;  %p226_p1 = scmp.lt.s32.totalorder %s14_s7, %s14_s7 }
   0x4   :  { %p222_p0 = scmp.ne.s32.totalorder %s14_s7, %s221_s8  ;;  %p227_p2 = scmp.lt.s32.totalorder %s221_s8, %s221_s8 }
   0x6   :  { %p228_p3 = por %p227_p2, %p226_p1 }
   0x8   :  { %p229_p4 = pnand %p228_p3, %p222_p0 }
   0xa   :  { %232 = shalt.err (!%p229_p4)
}
   0xb   :  { %s258_s9 = smov 128   ;;  %s259_s10 = smov 8  }
   0xc   :  { %19 = dma.hbm_to_vmem [thread:$0]  %s287_s0, 256, %s14_s7, [#allocation3], %s258_s9, %s258_s9, %s259_s10  }
   0xd   :  { %253 = dma.done.wait [#allocation3], 256  }
   0xe   :  { %254 = vsyncadd [#allocation3], 4294967040  ;;  %v23_v0 = vld [vmem:[#allocation2] sm:$0xff]  ;;  %v24_v1 = vld [vmem:[#allocation2 + $0x8] sm:$0xff]  ;;  %vm36_vm0 = vcmask 1046528   ;;  %vm68_vm1 = vcmask 1044480  }
   0xf   :  { %v25_v2 = vmul.f32 %v23_v0, %v23_v0  ;;  %v26_v3 = vmul.f32 %v24_v1, %v24_v1  ;;  %v37_v4 = vrot.slane %v23_v0, 1  ;;  %v38_v5 = vrot.slane %v24_v1, 1  ;;  %s260_s0 = smov [#allocation5]  }
  0x10   :  { %v69_v6 = vrot.slane %v23_v0, 3  ;;  %v70_v7 = vrot.slane %v24_v1, 3  ;;  %v85_v9 = vrot.slane %v23_v0, 4  ;;  %vm84_vm2 = vcmask 1043456   ;;  %s192_s13 = sshll.u32 %s260_s0, 4  ;;  %s193_s13 = int_to_ptr.vmem [resolvable:$true] %s192_s13 }
  0x11   :  { %v27_v8 = vadd.f32 %v26_v3, %v25_v2  ;;  %v39_v11 = vsel %vm36_vm0, %v37_v4, %v38_v5  ;;  %v40_v13 = vsel %vm36_vm0, %v38_v5, %v37_v4  ;;  %v86_v16 = vrot.slane %v24_v1, 4  ;;  %s233_s14 = scalar_lea.vmem %s193_s13, 64  ;;  %p238_p6 = scmp.lt.s32.totalorder %s193_s13, %s193_s13 }
  0x12   :  { %v71_v12 = vsel %vm68_vm1, %v69_v6, %v70_v7  ;;  %v72_v14 = vsel %vm68_vm1, %v70_v7, %v69_v6  ;;  %v43_v19 = vmul.f32 %v39_v11, %v23_v0  ;;  %v44_v23 = vmul.f32 %v40_v13, %v24_v1  ;;  %p234_p5 = scmp.ne.s32.totalorder %s193_s13, %s233_s14  ;;  %p239_p7 = scmp.lt.s32.totalorder %s233_s14, %s233_s14 }
  0x13   :  { %v28_v10 = vrot.slane %v27_v8, 4  ;;  %v75_v15 = vmul.f32 %v71_v12, %v23_v0  ;;  %v76_v18 = vmul.f32 %v72_v14, %v24_v1  ;;  %v87_v20 = vsel %vm84_vm2, %v85_v9, %v86_v16 }
  0x14   :  { %v88_v21 = vsel %vm84_vm2, %v86_v16, %v85_v9  ;;  %v91_v25 = vmul.f32 %v87_v20, %v23_v0  ;;  %v45_v30 = vadd.f32 %v44_v23, %v43_v19  ;;  %v53_v38 = vrot.slane %v23_v0, 2  ;;  %p240_p8 = por %p239_p7, %p238_p6 }
  0x15   :  { %v29_v17 = vadd.f32 %v28_v10, %v27_v8  ;;  %v77_v24 = vadd.f32 %v76_v18, %v75_v15  ;;  %v92_v26 = vmul.f32 %v88_v21, %v24_v1  ;;  %v54_v39 = vrot.slane %v24_v1, 2 }
  0x16   :  { %v46_v32 = vrot.slane %v45_v30, 4  ;;  %vm52_vm3 = vcmask 1045504   ;;  %p241_p9 = pnand %p240_p8, %p234_p5 }
  0x17   :  { %v30_v22 = vrot.slane %v29_v17, 2  ;;  %v274_v28 = vadd.f32 %v92_v26, %v91_v25  ;;  %v55_v43 = vsel %vm52_vm3, %v53_v38, %v54_v39  ;;  %v56_v44 = vsel %vm52_vm3, %v54_v39, %v53_v38 }
  0x18   :  { %v47_v34 = vadd.f32 %v46_v32, %v45_v30  ;;  %v59_v47 = vmul.f32 %v55_v43, %v23_v0  ;;  %v60_v48 = vmul.f32 %v56_v44, %v24_v1  ;;  %v78_v6 = vrot.slane %v77_v24, 4 }
  0x19   :  { %v31_v27 = vadd.f32 %v30_v22, %v29_v17  ;;  %v94_v25 = vrot.slane %v274_v28, 4 }
  0x1a   :  { %v48_v35 = vrot.slane %v47_v34, 2  ;;  %v61_v52 = vadd.f32 %v60_v48, %v59_v47  ;;  %v79_v10 = vadd.f32 %v78_v6, %v77_v24 }
  0x1b   :  { %v32_v29 = vrot.slane %v31_v27, 1  ;;  %v95_v24 = vadd.f32 %v94_v25, %v274_v28 }
  0x1c   :  { %v49_v36 = vadd.f32 %v48_v35, %v47_v34  ;;  %v62_v55 = vrot.slane %v61_v52, 4  ;;  %v80_v13 = vrot.slane %v79_v10, 2 }
  0x1d   :  { %v33_v31 = vadd.f32 %v32_v29, %v31_v27 }
  0x1e   :  { %v50_v40 = vrot.slane %v49_v36, 1  ;;  %v63_v58 = vadd.f32 %v62_v55, %v61_v52  ;;  %v81_v16 = vadd.f32 %v80_v13, %v79_v10 }
  0x1f   :  { %v101_v33 = vmax.f32 %v33_v31, 1e-07 }
  0x20   :  { %v276_v45 = vadd.f32 %v50_v40, %v49_v36  ;;  %v64_v60 = vrot.slane %v63_v58, 2  ;;  %v82_v18 = vrot.slane %v81_v16, 1 }
  0x21   :  { %205 = vrcp.f32 %v101_v33 }
  0x22   :  { %v100_v50 = vsub.f32 0.0, %v276_v45  ;;  %v65_v61 = vadd.f32 %v64_v60, %v63_v58  ;;  %v83_v21 = vadd.f32 %v82_v18, %v81_v16 }
  0x24   :  { %v66_v62 = vrot.slane %v65_v61, 1 }
  0x26   :  { %v67_v0 = vadd.f32 %v66_v62, %v65_v61 }
  0x2e   :  { %v206_v37 = vpop.eup %205 }
  0x2f   :  { %v103_v41 = vmul.f32 %v206_v37, %v101_v33 }
  0x31   :  { %v104_v42 = vsub.f32 2.0, %v103_v41 }
  0x33   :  { %v105_v46 = vmul.f32 %v206_v37, %v104_v42 }
  0x35   :  { %v106_v49 = vmul.f32 %v105_v46, %v101_v33  ;;  %v96_v33 = vrot.slane %v95_v24, 2 }
  0x37   :  { %v107_v51 = vsub.f32 2.0, %v106_v49  ;;  %v97_v37 = vadd.f32 %v96_v33, %v95_v24 }
  0x39   :  { %v108_v53 = vmul.f32 %v107_v51, %v105_v46  ;;  %v98_v41 = vrot.slane %v97_v37, 1 }
  0x3b   :  { %v109_v54 = vmul.f32 %v108_v53, %v100_v50  ;;  %v99_v44 = vadd.f32 %v98_v41, %v97_v37 }
  0x3d   :  { %v110_v56 = vmul.f32 %v109_v54, %v276_v45 }
  0x3f   :  { %v111_v57 = vadd.f32 %v110_v56, %v33_v31  ;;  %v112_v3 = vadd.f32 %v110_v56, %v67_v0 }
  0x41   :  { %v114_v59 = vmax.f32 %v111_v57, 1e-07  ;;  %v113_v7 = vsub.f32 0.0, %v112_v3 }
  0x43   :  { %207 = vrcp.f32 %v114_v59 }
  0x50   :  { %v208_v63 = vpop.eup %207 }
  0x51   :  { %v116_v1 = vmul.f32 %v208_v63, %v114_v59 }
  0x53   :  { %v117_v2 = vsub.f32 2.0, %v116_v1 }
  0x55   :  { %v118_v4 = vmul.f32 %v208_v63, %v117_v2 }
  0x57   :  { %v119_v5 = vmul.f32 %v118_v4, %v114_v59 }
  0x59   :  { %v120_v8 = vsub.f32 2.0, %v119_v5 }
  0x5b   :  { %v121_v9 = vmul.f32 %v120_v8, %v118_v4 }
  0x5d   :  { %v122_v11 = vmul.f32 %v121_v9, %v113_v7 }
  0x5f   :  { %v128_v12 = vmul.f32 %v122_v11, %v122_v11  ;;  %v123_v19 = vmul.f32 0.0, %v122_v11  ;;  %v125_v20 = vmul.f32 %v122_v11, %v109_v54  ;;  %v134_v31 = vmul.f32 %v122_v11, %v276_v45 }
  0x61   :  { %v129_v14 = vsub.f32 1.0, %v128_v12  ;;  %v124_v22 = vadd.f32 1.0, %v123_v19  ;;  %v126_v23 = vadd.f32 %v125_v20, %v109_v54 }
  0x63   :  { %v130_v15 = vmul.f32 %v129_v14, %v111_v57  ;;  %v131_v26 = vmul.f32 %v124_v22, %v83_v21  ;;  %v132_v27 = vmul.f32 %v126_v23, %v67_v0 }
  0x65   :  { %v137_v17 = vmax.f32 %v130_v15, 1e-07  ;;  %v133_v30 = vadd.f32 %v132_v27, %v131_v26 }
  0x67   :  { %209 = vrcp.f32 %v137_v17  ;;  %v135_v35 = vadd.f32 %v134_v31, %v133_v30 }
  0x69   :  { %v136_v39 = vsub.f32 0.0, %v135_v35 }
  0x74   :  { %v210_v29 = vpop.eup %209 }
  0x75   :  { %v139_v32 = vmul.f32 %v210_v29, %v137_v17 }
  0x77   :  { %v140_v34 = vsub.f32 2.0, %v139_v32 }
  0x79   :  { %v141_v36 = vmul.f32 %v210_v29, %v140_v34 }
  0x7b   :  { %v142_v38 = vmul.f32 %v141_v36, %v137_v17 }
  0x7d   :  { %v143_v40 = vsub.f32 2.0, %v142_v38 }
  0x7f   :  { %v144_v42 = vmul.f32 %v143_v40, %v141_v36 }
  0x81   :  { %v145_v43 = vmul.f32 %v144_v42, %v136_v39 }
  0x83   :  { %v146_v46 = vmul.f32 0.0, %v145_v43  ;;  %v148_v47 = vmul.f32 %v145_v43, %v122_v11  ;;  %v150_v28 = vmul.f32 %v145_v43, %v126_v23  ;;  %v154_v48 = vmul.f32 %v145_v43, %v145_v43 }
  0x84   :  { %v152_v52 = vmul.f32 %v145_v43, %v124_v22 }
  0x85   :  { %v147_v49 = vadd.f32 %v146_v46, %v124_v22  ;;  %v149_v50 = vadd.f32 %v148_v47, %v126_v23  ;;  %v151_v51 = vadd.f32 %v150_v28, %v122_v11  ;;  %v155_v53 = vsub.f32 1.0, %v154_v48 }
  0x86   :  { %v162_v59 = vmul.f32 %v152_v52, %v276_v45 }
  0x87   :  { %v157_v54 = vmul.f32 %v147_v49, %v99_v44  ;;  %v158_v55 = vmul.f32 %v149_v50, %v83_v21  ;;  %v160_v56 = vmul.f32 %v151_v51, %v67_v0  ;;  %v156_v57 = vmul.f32 %v155_v53, %v130_v15 }
  0x89   :  { %v159_v58 = vadd.f32 %v158_v55, %v157_v54  ;;  %v165_v60 = vmax.f32 %v156_v57, 1e-07 }
  0x8b   :  { %v161_v61 = vadd.f32 %v160_v56, %v159_v58  ;;  %211 = vrcp.f32 %v165_v60 }
  0x8d   :  { %v163_v62 = vadd.f32 %v162_v59, %v161_v61 }
  0x8f   :  { %v164_v5 = vsub.f32 0.0, %v163_v62 }
  0x98   :  { %v212_v63 = vpop.eup %211 }
  0x99   :  { %v167_v1 = vmul.f32 %v212_v63, %v165_v60 }
  0x9b   :  { %v168_v2 = vsub.f32 2.0, %v167_v1 }
  0x9d   :  { %v169_v3 = vmul.f32 %v212_v63, %v168_v2 }
  0x9f   :  { %v170_v4 = vmul.f32 %v169_v3, %v165_v60 }
  0xa1   :  { %v171_v6 = vsub.f32 2.0, %v170_v4 }
  0xa3   :  { %v172_v7 = vmul.f32 %v171_v6, %v169_v3 }
  0xa5   :  { %v173_v8 = vmul.f32 %v172_v7, %v164_v5 }
  0xa7   :  { %v174_v0 = vmul.f32 %v173_v8, %v152_v52  ;;  %v176_v9 = vmul.f32 %v173_v8, %v151_v51  ;;  %v178_v10 = vmul.f32 %v173_v8, %v149_v50  ;;  %v180_v11 = vmul.f32 %v173_v8, %v147_v49 }
  0xa9   :  { %v175_v45 = vadd.f32 %v174_v0, %v149_v50  ;;  %v177_v12 = vadd.f32 %v176_v9, %v151_v51  ;;  %v179_v13 = vadd.f32 %v178_v10, %v152_v52  ;;  %185 = vst [vmem:[#allocation5 + $0x3] sm:$0x1] %v180_v11 }
  0xab   :  { %182 = vst [vmem:[#allocation5] sm:$0x1] %v175_v45  ;;  %183 = vst [vmem:[#allocation5 + $0x1] sm:$0x1] %v177_v12 }
  0xac   :  { %184 = vst [vmem:[#allocation5 + $0x2] sm:$0x1] %v179_v13 }
  0xad   :  { %244 = shalt.err (!%p241_p9)
}
  0xae   :  { %195 = dma.vmem_to_hbm [thread:$0]  %s193_s13, 64, %s288_s1, [#allocation4]  }
  0xaf   :  { %255 = dma.done.wait [#allocation4], 64  }
  0xb0   :  { %256 = vsyncadd [#allocation4], 4294967232 }
  0xb1   :  { %199 = vsyncpa [#allocation3], 1 }
  0xb2   :  { %200 = vsyncpa [#allocation4], 1 }

</bundles_post_ra>
